<compile_context>
chip_gen: v5e
topology: v5e:2x2
jax: 0.10.0
libtpu: 0.0.40
codegen_flags: <defaults>
</compile_context>

<pallas_src>
import math

import jax
import jax.numpy as jnp
from jax.experimental import pallas as pl
from jax.experimental.pallas import tpu as pltpu


_BLOCK_BUDGET_BYTES = 4 * 1024 * 1024   # per-block budget; 2 bufs x (in+out) ~ 16 MiB live
_VMEM_LIMIT_BYTES = 32 * 1024 * 1024    # safe scoped VMEM limit on v5e/v6e/v7x
_MAX_FOLD_LANES = 2048                  # lane width target for folded layouts
_MIN_ROW_STEPS = 4                      # keep the grid long enough for v7x's 2 TCs


def _cdiv(a: int, b: int) -> int:
    return -(-a // b)


def _round_up(v: int, m: int) -> int:
    return _cdiv(v, m) * m


def _round_down(v: int, m: int) -> int:
    return (v // m) * m


def _sublane_multiple(dtype) -> int:
    # Packed sub-32-bit dtypes need 16/32-row tiles; 32-bit needs 8.
    return {4: 8, 2: 16, 1: 32}.get(jnp.dtype(dtype).itemsize, 8)


def _choose_fold_lanes(total: int):
    """Largest lane width in {128..2048} dividing `total`, preferring >= 8 rows."""
    best = None
    for lanes in (2048, 1024, 512, 256, 128):
        if total % lanes == 0:
            if best is None:
                best = lanes
            if total // lanes >= 8:
                return lanes
    return best  # None if 128 does not divide total


def _prelu_scalar_kernel(alpha_ref, x_ref, o_ref):
    # alpha_ref: (1, 1) SMEM scalar; x_ref/o_ref: (TR, TC) VMEM tiles.
    x = x_ref[...]
    a = alpha_ref[0, 0].astype(x.dtype)
    o_ref[...] = jnp.where(x >= 0, x, a * x)


def _prelu_row_kernel(x_ref, alpha_ref, o_ref):
    # alpha_ref: (1, TC) VMEM row, broadcasts over the sublane (row) axis.
    x = x_ref[...]
    a = alpha_ref[...]
    o_ref[...] = jnp.where(x >= 0, x, a * x)


def _launch(x2d, alpha, alpha_row, scalar_alpha):
    R, C = x2d.shape
    dtype = x2d.dtype
    itemsize = jnp.dtype(dtype).itemsize
    sub = _sublane_multiple(dtype)

    # Column blocking only when a sublane-minimal full-width block busts the budget.
    if C * itemsize * sub > _BLOCK_BUDGET_BYTES:
        tc = max(128, _round_down(_BLOCK_BUDGET_BYTES // (itemsize * sub), 128))
    else:
        tc = C

    # Row blocking from the remaining per-block budget ...
    tr = max(sub, _round_down(_BLOCK_BUDGET_BYTES // (tc * itemsize), sub))
    # ... but keep at least a few row steps so both v7x TensorCores get work.
    tr = min(tr, max(sub, _round_up(_cdiv(R, _MIN_ROW_STEPS), sub)))
    if tr >= R:
        tr = R  # full row extent: always a legal block dim

    grid = (_cdiv(R, tr), _cdiv(C, tc))
    x_spec = pl.BlockSpec((tr, tc), lambda i, j: (i, j))
    o_spec = pl.BlockSpec((tr, tc), lambda i, j: (i, j))
    cparams = pltpu.CompilerParams(
        dimension_semantics=("parallel", "parallel"),
        vmem_limit_bytes=_VMEM_LIMIT_BYTES,
    )
    out_shape = jax.ShapeDtypeStruct((R, C), dtype)

    if scalar_alpha:
        alpha_smem = jnp.asarray(alpha, dtype=jnp.float32).reshape(1, 1)
        return pl.pallas_call(
            _prelu_scalar_kernel,
            out_shape=out_shape,
            grid=grid,
            in_specs=[
                pl.BlockSpec(memory_space=pltpu.MemorySpace.SMEM),
                x_spec,
            ],
            out_specs=o_spec,
            compiler_params=cparams,
        )(alpha_smem, x2d)
    else:
        return pl.pallas_call(
            _prelu_row_kernel,
            out_shape=out_shape,
            grid=grid,
            in_specs=[
                x_spec,
                pl.BlockSpec((1, tc), lambda i, j: (0, j)),
            ],
            out_specs=o_spec,
            compiler_params=cparams,
        )(x2d, alpha_row)


def prelu(x: jax.Array, alpha: jax.Array) -> jax.Array:
    """PReLU forward matching the spec module's right-aligned alpha broadcast."""
    orig_shape = x.shape
    dtype = x.dtype
    total = x.size
    w = orig_shape[-1] if x.ndim >= 1 else 1
    p = int(alpha.size)
    if p not in (1, w):
        raise ValueError(
            f"alpha of size {p} does not broadcast against last dim {w}")
    if total == 0:
        return x

    scalar_alpha = (p == 1)

    # ---- choose a copy-free 2D view of x (reshape only; no pad / slice) ----
    if scalar_alpha:
        lanes = _choose_fold_lanes(total)
        if lanes is not None:
            # Fold the flat stream into a lane-dense (rows, lanes) slab — free.
            x2d = x.reshape(total // lanes, lanes)
        else:
            # Odd total (128 does not divide it): natural layout, still free.
            x2d = x.reshape(max(total // w, 1), max(w, 1))
        alpha_row = None
    else:
        if w % 128 == 0:
            # Channel axis already lane-dense; natural layout is free.
            x2d = x.reshape(total // w, w)
            alpha_row = alpha.astype(dtype).reshape(1, w)
        else:
            base = math.lcm(w, 128)
            if total % base == 0:
                # Fold to a lane-dense width that is a multiple of w (free reshape);
                # alpha is tiled into one small resident row (<= 2048 elems).
                lanes = base
                while (lanes * 2 <= _MAX_FOLD_LANES
                       and total % (lanes * 2) == 0
                       and total // (lanes * 2) >= 8):
                    lanes *= 2
                x2d = x.reshape(total // lanes, lanes)
                alpha_row = jnp.tile(alpha.astype(dtype), lanes // w).reshape(1, lanes)
            else:
                # Ragged: natural (rows, w) view — still copy-free; stores are
                # partially masked only when w is not a multiple of 128.
                x2d = x.reshape(total // w, w)
                alpha_row = alpha.astype(dtype).reshape(1, w)

    out2d = _launch(x2d, alpha, alpha_row, scalar_alpha)
    return out2d.reshape(orig_shape)


if __name__ == "__main__":
    key = jax.random.PRNGKey(0)
    x = jax.random.normal(key, (2, 4, 16, 16), dtype=jnp.float32)

    # Default module config: num_parameters=1, init=0.25 -> scalar-alpha path.
    alpha1 = jnp.full((1,), 0.25, dtype=jnp.float32)
    out1 = prelu(x, alpha1)
    jax.block_until_ready(out1)
    ref1 = jnp.maximum(x, 0.0) + alpha1 * jnp.minimum(x, 0.0)
    assert out1.shape == x.shape and out1.dtype == x.dtype
    assert jnp.allclose(out1, ref1, atol=1e-6, rtol=1e-6)

    # num_parameters == last dim (16): per-position alpha path, matching the
    # module's right-aligned broadcast semantics.
    alpha16 = jnp.linspace(0.05, 0.8, 16, dtype=jnp.float32)
    out16 = prelu(x, alpha16)
    jax.block_until_ready(out16)
    ref16 = jnp.maximum(x, 0.0) + alpha16 * jnp.minimum(x, 0.0)
    assert out16.shape == x.shape and out16.dtype == x.dtype
    assert jnp.allclose(out16, ref16, atol=1e-6, rtol=1e-6)

    print("KERNEL_OK")
</pallas_src>

<mosaic_0001>
module attributes {stable_mosaic.version = 11 : i64} {
  func.func @_prelu_scalar_kernel(%arg0: i32, %arg1: i32, %arg2: memref<1x1xf32, #tpu.memory_space<smem>>, %arg3: memref<8x256xf32, #tpu.memory_space<vmem>>, %arg4: memref<8x256xf32, #tpu.memory_space<vmem>>) attributes {dimension_semantics = [#tpu.dimension_semantics<parallel>, #tpu.dimension_semantics<parallel>], iteration_bounds = array<i64: 1, 1>, scalar_prefetch = 0 : i64, scratch_operands = 0 : i64, tpu.core_type = #tpu.core_type<tc>, window_params = [{transform_indices = @transform_0, window_bounds = array<i64: 1, 1>}, {transform_indices = @transform_1, window_bounds = array<i64: 8, 256>}, {transform_indices = @transform_2, window_bounds = array<i64: 8, 256>}]} {
    %c0 = arith.constant 0 : index
    %c0_0 = arith.constant 0 : index
    %0 = vector.load %arg3[%c0, %c0_0] : memref<8x256xf32, #tpu.memory_space<vmem>>, vector<8x256xf32>
    %c0_1 = arith.constant 0 : index
    %c0_2 = arith.constant 0 : index
    %1 = memref.load %arg2[%c0_1, %c0_2] : memref<1x1xf32, #tpu.memory_space<smem>>
    %cst = arith.constant 0.000000e+00 : f32
    %2 = vector.broadcast %cst : f32 to vector<8x256xf32>
    %3 = arith.cmpf oge, %0, %2 : vector<8x256xf32>
    %4 = vector.broadcast %1 : f32 to vector<8x256xf32>
    %5 = arith.mulf %4, %0 : vector<8x256xf32>
    %6 = arith.select %3, %0, %5 : vector<8x256xi1>, vector<8x256xf32>
    %c0_3 = arith.constant 0 : index
    %c0_4 = arith.constant 0 : index
    %7 = vector.load %arg4[%c0_3, %c0_4] : memref<8x256xf32, #tpu.memory_space<vmem>>, vector<8x256xf32>
    tpu.vector_store %arg4[%c0_3, %c0_4], %6 {strides = array<i32>} : memref<8x256xf32, #tpu.memory_space<vmem>>, vector<8x256xf32>,
    return
  }
  func.func @transform_0(%arg0: i32, %arg1: i32) -> (i32, i32) {
    %c0_i32 = arith.constant 0 : i32
    %c0_i32_0 = arith.constant 0 : i32
    %c0_i32_1 = arith.constant 0 : i32
    return %c0_i32, %c0_i32_0 : i32, i32
  }
  func.func @transform_1(%arg0: i32, %arg1: i32) -> (i32, i32) {
    %c0_i32 = arith.constant 0 : i32
    return %arg0, %arg1 : i32, i32
  }
  func.func @transform_2(%arg0: i32, %arg1: i32) -> (i32, i32) {
    %c0_i32 = arith.constant 0 : i32
    return %arg0, %arg1 : i32, i32
  }
}

</mosaic_0001>

<bundles_post_ra>
// kernel: tpu_custom_call.1
= control target key start
LH: loop header
LB: loop body
LE: loop exit
PB: predicated region body
PF: predicated region fallthrough
CT: control target
= control target key end

     0   :  { %8 = vsyncpa [#allocation4], 0  ;;  %s136_s0 = inlined_call_operand.<no memory space> [shape: f32[1,1], index: 0, kind: input, shape index: {}]   ;;  %s137_s1 = inlined_call_operand.hbm [shape: f32[8,256], index: 1, kind: input, shape index: {}]   ;;  %s138_s2 = inlined_call_operand.hbm [shape: f32[8,256], index: 2, kind: output, shape index: {}]  }
   0x1   :  { %9 = vsyncpa [#allocation5], 0  ;;  %s17_s11 = sshll.u32 %s137_s1, 4  ;;  %s110_s12 = smov [#allocation3]   ;;  %s18_s11 = int_to_ptr.hbm [resolvable:$true] %s17_s11 }
   0x2   :  { %s19_s13 = sshll.u32 %s110_s12, 4  ;;  %s20_s13 = int_to_ptr.vmem [resolvable:$true] %s19_s13 }
   0x3   :  { %22 = dma.hbm_to_vmem [thread:$0]  %s18_s11, 256, %s20_s13, [#allocation4]  }
   0x4   :  { %106 = dma.done.wait [#allocation4], 256  }
   0x5   :  { %107 = vsyncadd [#allocation4], 4294967040  ;;  %v32_v0 = vstv %s136_s0  ;;  %v27_v1 = vld [vmem:[#allocation3] sm:$0xff]  ;;  %v28_v2 = vld [vmem:[#allocation3 + $0x8] sm:$0xff]  ;;  %s111_s16 = smov [#allocation6]   ;;  %s46_s20 = sshll.u32 %s138_s2, 4  ;;  %s47_s20 = int_to_ptr.hbm [resolvable:$true] %s46_s20 }
   0x6   :  { %s44_s17 = sshll.u32 %s111_s16, 4  ;;  %vm30_vm0 = vcmp.ge.f32.partialorder %v27_v1, 0.0  ;;  %v33_v3 = vmul.f32 %v32_v0, %v27_v1  ;;  %vm31_vm1 = vcmp.ge.f32.partialorder %v28_v2, 0.0  ;;  %v34_v4 = vmul.f32 %v32_v0, %v28_v2  ;;  %s45_s17 = int_to_ptr.vmem [resolvable:$true] %s44_s17 }
   0x8   :  { %v35_v5 = vsel %vm30_vm0, %v27_v1, %v33_v3  ;;  %v36_v6 = vsel %vm31_vm1, %v28_v2, %v34_v4 }
   0x9   :  { %37 = vst [vmem:[#allocation6] sm:$0xff] %v35_v5 }
   0xa   :  { %38 = vst [vmem:[#allocation6 + $0x8] sm:$0xff] %v36_v6 }
   0xb   :  { %49 = dma.vmem_to_hbm [thread:$0]  %s45_s17, 256, %s47_s20, [#allocation5]  }
   0xc   :  { %108 = dma.done.wait [#allocation5], 256  }
   0xd   :  { %109 = vsyncadd [#allocation5], 4294967040 }
   0xe   :  { %54 = vsyncpa [#allocation4], 1 }
   0xf   :  { %55 = vsyncpa [#allocation5], 1 }

</bundles_post_ra>
